<compile_context>
chip_gen: v7x
topology: tpu7x:2x2x1
jax: 0.10.0
libtpu: 0.0.40
codegen_flags: <defaults>
</compile_context>

<pallas_src>
from functools import partial

import numpy as np
import jax
import jax.numpy as jnp
from jax.experimental import pallas as pl
from jax.experimental.pallas import tpu as pltpu


def _round_up(n, m):
    return ((n + m - 1) // m) * m


# ---------------------------------------------------------------------------
# Fused kernel: whole forward pass for one batch tile.
# ---------------------------------------------------------------------------
def _fused_ldr_kernel(x_ref, a_ref, ldrwt_ref, *refs, n_layers, mxu_dtype, in_pads):
    """refs = [wt_0, b_0, wt_1, b_1, ..., o_ref].

    x_ref     : (TB, in_pad)              f32 feature tile
    a_ref     : (TB, al_pad)              bf16 (or f32) binary missing-data mask tile
    ldrwt_ref : (al_pad, sum(in_pad_i))   concat of all W_i.T (padded, mxu_dtype)
    wt_i      : (in_pad_i, out_pad_i)     weight.T (padded, mxu_dtype)
    b_i       : (1, out_pad_i)            bias (padded, f32)
    o_ref     : (TB, out_pad_last)        f32 output tile
    """
    o_ref = refs[-1]
    wrefs = refs[:-1]

    a_raw = a_ref[...]                       # exact 0/1 values (bf16-safe)
    a = a_raw.astype(jnp.float32)
    h = x_ref[...] * (1.0 - a)               # imputation  x * (1 - a)   (f32)
    a_mx = a_raw.astype(mxu_dtype)

    # Shared-LHS fusion: all layers' LDR corrections use the same LHS (a), so
    # one wide matmul replaces L small K=128 matmuls (better MXU fill).
    ldr_all = jnp.dot(a_mx, ldrwt_ref[...],
                      preferred_element_type=jnp.float32)   # (TB, sum(in_pad_i))

    # TODO(synk): for deep networks with uniform widths, stack the weights and
    # switch this static unroll to lax.fori_loop to bound live ranges.
    off = 0
    for i in range(n_layers):                # static loop -> fully unrolled
        in_p = in_pads[i]
        wt = wrefs[2 * i][...]               # (in_p, out_p)  mxu_dtype
        b = wrefs[2 * i + 1][...]            # (1, out_p)     f32
        ldr = ldr_all[:, off:off + in_p]     # 128-aligned static lane slice
        off += in_p

        lin = jnp.dot(h.astype(mxu_dtype), wt,
                      preferred_element_type=jnp.float32)    # (TB, out_p)

        # Epilogue stays f32 (VPU/XLU; safe on v5e which lacks bf16 VPU).
        corr = jnp.sum(ldr * h, axis=1, keepdims=True)        # (TB, 1)
        h = lin + b + corr
        if i < n_layers - 1:
            h = jnp.maximum(h, 0.0)

    o_ref[...] = h.astype(o_ref.dtype)


# ---------------------------------------------------------------------------
# One-time parameter preparation: transpose, zero-pad to 128 lanes, cast,
# and concatenate the LDR matrices for the shared-LHS fusion.
# ---------------------------------------------------------------------------
def prepare_ldr_params(params, mxu_dtype=jnp.bfloat16):
    """params: list of (weight (out,in), bias (out,), W (in, alpha)) per layer.

    Returns dict with
      wts       : tuple of (in_pad_i, out_pad_i) = padded weight.T, mxu_dtype
      biases    : tuple of (1, out_pad_i)        = padded bias, f32
      ldrwt_all : (al_pad, sum(in_pad_i))        = concat of padded W_i.T, mxu_dtype
    Zero padding is exact for this model (padded rows/cols contribute 0).
    """
    wts, biases, ldr_blocks = [], [], []
    al_p = _round_up(params[0][2].shape[1], 128)
    for (w, b, Wl) in params:
        size_out, size_in = w.shape
        dim_alpha = Wl.shape[1]
        in_p = _round_up(size_in, 128)
        out_p = _round_up(size_out, 128)

        wt = jnp.zeros((in_p, out_p), mxu_dtype)
        wt = wt.at[:size_in, :size_out].set(jnp.asarray(w).T.astype(mxu_dtype))

        b2 = jnp.zeros((1, out_p), jnp.float32)
        b2 = b2.at[0, :size_out].set(jnp.asarray(b).astype(jnp.float32))

        ldrwt = jnp.zeros((al_p, in_p), mxu_dtype)
        ldrwt = ldrwt.at[:dim_alpha, :size_in].set(
            jnp.asarray(Wl).T.astype(mxu_dtype))

        wts.append(wt)
        biases.append(b2)
        ldr_blocks.append(ldrwt)

    ldrwt_all = jnp.concatenate(ldr_blocks, axis=1)
    return {"wts": tuple(wts), "biases": tuple(biases), "ldrwt_all": ldrwt_all}


def _bcast_spec(shape, single_buffer):
    """BlockSpec for a grid-invariant (broadcast) operand."""
    nd = len(shape)
    idx = lambda *_: (0,) * nd
    if single_buffer:
        # Constant index_map -> the pipeline only DMAs this once; a single
        # buffer halves its resident VMEM (matters most on v7x's 64 MiB).
        return pl.BlockSpec(shape, idx, pipeline_mode=pl.Buffered(1))
    return pl.BlockSpec(shape, idx)


# ---------------------------------------------------------------------------
# Jitted forward: single fused pallas_call over a batch grid.
# ---------------------------------------------------------------------------
@partial(jax.jit, static_argnames=("output_size", "single_buffer_weights"))
def _forward_impl(x, a, prepared, *, output_size, single_buffer_weights):
    wts = prepared["wts"]
    biases = prepared["biases"]
    ldrwt_all = prepared["ldrwt_all"]
    n_layers = len(wts)

    B, in_size = x.shape
    al_size = a.shape[1]
    in_pads = tuple(int(w.shape[0]) for w in wts)
    out_pads = tuple(int(w.shape[1]) for w in wts)
    in_pad = in_pads[0]
    al_pad = int(ldrwt_all.shape[0])
    out_pad = out_pads[-1]
    mxu_dtype = wts[0].dtype
    mask_dtype = jnp.bfloat16            # binary 0/1 mask: bf16 is exact
    mask_bytes = jnp.dtype(mask_dtype).itemsize

    # ---- batch tiling: multiple of 16 sublanes (bf16 mask), cap 512 rows.
    # The cdiv(B,2) term keeps >=2 grid steps for medium batches so v7x's
    # second TensorCore gets work via dimension_semantics=("parallel",).
    TB = max(16, min(512, _round_up(-(-B // 2), 16)))

    # ---- VMEM budgeting (single-buffered weights, double-buffered IO tiles,
    # plus the f32 activation working set).  40 MiB cap leaves headroom under
    # v7x's 64 MiB physical VMEM.
    w_bytes = sum(int(np.prod(t.shape)) * t.dtype.itemsize
                  for t in (*wts, *biases, ldrwt_all))
    sum_in = sum(in_pads)
    max_w = max(max(in_pads), max(out_pads), al_pad)

    def _est(tb):
        io = 2 * tb * (4 * in_pad + mask_bytes * al_pad + 4 * out_pad)
        act = 4 * tb * (sum_in + 4 * max_w)
        return w_bytes + io + act

    VMEM_BUDGET = 40 << 20
    while TB > 16 and _est(TB) > VMEM_BUDGET:
        TB = _round_up(TB // 2, 16)
    # TODO(synk): if resident weights alone exceed the budget (very wide/deep
    # models), stream weights per layer (extra grid axis / emit_pipeline)
    # instead of full VMEM residency.
    vmem_limit = int(min(VMEM_BUDGET, max(16 << 20, int(1.5 * _est(TB)))))

    B_pad = _round_up(B, TB)

    # ---- inputs: avoid materializing padded HBM copies unless required.
    x32 = x.astype(jnp.float32)
    if (B_pad != B) or (in_pad != in_size):
        x_p = jnp.pad(x32, ((0, B_pad - B), (0, in_pad - in_size)))
    else:
        x_p = x32
    am = a.astype(mask_dtype)
    if (B_pad != B) or (al_pad != al_size):
        a_p = jnp.pad(am, ((0, B_pad - B), (0, al_pad - al_size)))
    else:
        a_p = am

    in_specs = [
        pl.BlockSpec((TB, in_pad), lambda i: (i, 0)),
        pl.BlockSpec((TB, al_pad), lambda i: (i, 0)),
        _bcast_spec(ldrwt_all.shape, single_buffer_weights),
    ]
    operands = [x_p, a_p, ldrwt_all]
    for wt, b2 in zip(wts, biases):
        operands += [wt, b2]
        in_specs += [_bcast_spec(wt.shape, single_buffer_weights),
                     _bcast_spec(b2.shape, single_buffer_weights)]

    kernel = partial(_fused_ldr_kernel, n_layers=n_layers,
                     mxu_dtype=mxu_dtype, in_pads=in_pads)
    out_p = pl.pallas_call(
        kernel,
        out_shape=jax.ShapeDtypeStruct((B_pad, out_pad), jnp.float32),
        grid=(B_pad // TB,),
        in_specs=in_specs,
        out_specs=pl.BlockSpec((TB, out_pad), lambda i: (i, 0)),
        compiler_params=pltpu.CompilerParams(
            dimension_semantics=("parallel",),
            vmem_limit_bytes=vmem_limit),
    )(*operands)

    return out_p[:B, :output_size]


def adaptive_ldr_forward(x, a, prepared, *, output_size):
    """Adaptive_LDR_Regression.forward (apply_LDR=True).

    Tries single-buffered broadcast weights first; falls back to the default
    (double-buffered) specs on JAX versions that reject pl.Buffered(1) here.
    """
    try:
        return _forward_impl(x, a, prepared, output_size=output_size,
                             single_buffer_weights=True)
    except Exception:
        return _forward_impl(x, a, prepared, output_size=output_size,
                             single_buffer_weights=False)


# ---------------------------------------------------------------------------
# Plain-JAX reference and synthetic init (for correctness check).
# ---------------------------------------------------------------------------
def _reference_forward(x, a, params):
    """Mirrors the PyTorch forward (apply_LDR=True)."""
    h = x * (1.0 - a)
    n_layers = len(params)
    for idx, (w, b, Wl) in enumerate(params):
        h = h @ w.T + b + jnp.sum((a @ Wl.T) * h, axis=1, keepdims=True)
        if idx < n_layers - 1:
            h = jnp.maximum(h, 0.0)
    return h


def init_params(key, input_size, hidden_sizes, output_size):
    """Deterministic synthetic init matching LDR_Layer parameter shapes."""
    layer_sizes = [input_size] + hidden_sizes + [output_size]
    params = []
    for i in range(len(layer_sizes) - 1):
        size_in, size_out = layer_sizes[i], layer_sizes[i + 1]
        key, kw, kb, kW = jax.random.split(key, 4)
        bound = 1.0 / np.sqrt(size_in)
        weight = jax.random.uniform(kw, (size_out, size_in), jnp.float32, -bound, bound)
        bias = jax.random.uniform(kb, (size_out,), jnp.float32, -bound, bound)
        # Torch init is zeros; use small nonzero values so the LDR path is exercised.
        W_ldr = 0.05 * jax.random.normal(kW, (size_in, input_size), jnp.float32)
        params.append((weight, bias, W_ldr))
    return params


# TODO(synk): training / adversarial-attack helpers (greedy_missing_data_attack,
# l1_norm_attack, epoch_train, predict/projection, ...) are host-side control
# flow, not kernel work.

if __name__ == "__main__":
    B, INPUT, HIDDEN, OUTPUT = 8, 16, [32], 4

    key = jax.random.PRNGKey(0)
    key, kx, ka = jax.random.split(key, 3)
    x = jax.random.normal(kx, (B, INPUT), jnp.float32)
    # binary missing-data mask (a == 1 -> feature missing)
    a = (jax.random.uniform(ka, (B, INPUT)) < 0.2).astype(jnp.float32)

    params = init_params(key, INPUT, HIDDEN, OUTPUT)
    y_ref = _reference_forward(x, a, params)

    # f32 MXU path: exact check against the reference.
    prep_f32 = prepare_ldr_params(params, mxu_dtype=jnp.float32)
    y_kernel = adaptive_ldr_forward(x, a, prep_f32, output_size=OUTPUT)
    jax.block_until_ready(y_kernel)
    np.testing.assert_allclose(np.asarray(y_kernel), np.asarray(y_ref),
                               rtol=1e-5, atol=1e-5)

    # bf16 MXU path (default; good on all of v5e/v6e/v7x), f32 epilogue.
    # NOTE: the bf16 matmuls are an intentional approximation -> loose tolerance.
    prep_bf16 = prepare_ldr_params(params, mxu_dtype=jnp.bfloat16)
    y_bf16 = adaptive_ldr_forward(x, a, prep_bf16, output_size=OUTPUT)
    jax.block_until_ready(y_bf16)
    np.testing.assert_allclose(np.asarray(y_bf16), np.asarray(y_ref),
                               rtol=5e-2, atol=5e-2)

    print("KERNEL_OK")
</pallas_src>

<mosaic_0001>
module attributes {stable_mosaic.version = 11 : i64} {
  func.func @_fused_ldr_kernel(%arg0: i32, %arg1: memref<16x128xf32, #tpu.memory_space<vmem>>, %arg2: memref<16x128xbf16, #tpu.memory_space<vmem>>, %arg3: memref<128x256xf32, #tpu.memory_space<vmem>>, %arg4: memref<128x128xf32, #tpu.memory_space<vmem>>, %arg5: memref<1x128xf32, #tpu.memory_space<vmem>>, %arg6: memref<128x128xf32, #tpu.memory_space<vmem>>, %arg7: memref<1x128xf32, #tpu.memory_space<vmem>>, %arg8: memref<16x128xf32, #tpu.memory_space<vmem>>) attributes {dimension_semantics = [#tpu.dimension_semantics<parallel>], iteration_bounds = array<i64: 1>, scalar_prefetch = 0 : i64, scratch_operands = 0 : i64, tpu.core_type = #tpu.core_type<tc>, window_params = [{transform_indices = @transform_0, window_bounds = array<i64: 16, 128>}, {transform_indices = @transform_1, window_bounds = array<i64: 16, 128>}, {pipeline_mode = #tpu.pipeline_mode<synchronous>, transform_indices = @transform_2, window_bounds = array<i64: 128, 256>}, {pipeline_mode = #tpu.pipeline_mode<synchronous>, transform_indices = @transform_3, window_bounds = array<i64: 128, 128>}, {pipeline_mode = #tpu.pipeline_mode<synchronous>, transform_indices = @transform_4, window_bounds = array<i64: 1, 128>}, {pipeline_mode = #tpu.pipeline_mode<synchronous>, transform_indices = @transform_5, window_bounds = array<i64: 128, 128>}, {pipeline_mode = #tpu.pipeline_mode<synchronous>, transform_indices = @transform_6, window_bounds = array<i64: 1, 128>}, {transform_indices = @transform_7, window_bounds = array<i64: 16, 128>}]} {
    %c0 = arith.constant 0 : index
    %c0_0 = arith.constant 0 : index
    %0 = vector.load %arg2[%c0, %c0_0] : memref<16x128xbf16, #tpu.memory_space<vmem>>, vector<16x128xbf16>
    %1 = arith.extf %0 : vector<16x128xbf16> to vector<16x128xf32>
    %c0_1 = arith.constant 0 : index
    %c0_2 = arith.constant 0 : index
    %2 = vector.load %arg1[%c0_1, %c0_2] : memref<16x128xf32, #tpu.memory_space<vmem>>, vector<16x128xf32>
    %cst = arith.constant 1.000000e+00 : f32
    %3 = vector.broadcast %cst : f32 to vector<16x128xf32>
    %4 = arith.subf %3, %1 : vector<16x128xf32>
    %5 = arith.mulf %2, %4 : vector<16x128xf32>
    %6 = arith.extf %0 : vector<16x128xbf16> to vector<16x128xf32>
    %c0_3 = arith.constant 0 : index
    %c0_4 = arith.constant 0 : index
    %7 = vector.load %arg3[%c0_3, %c0_4] : memref<128x256xf32, #tpu.memory_space<vmem>>, vector<128x256xf32>
    %cst_5 = arith.constant dense<0.000000e+00> : vector<16x256xf32>
    %8 = tpu.matmul %6, %7, %cst_5 {dimension_numbers = #tpu.dot_dimension_numbers<[1], [0], [0], [1], [0, 0, 1, 1], [], []>} : vector<16x128xf32>, vector<128x256xf32>, vector<16x256xf32> -> vector<16x256xf32>
    %c0_6 = arith.constant 0 : index
    %c0_7 = arith.constant 0 : index
    %9 = vector.load %arg4[%c0_6, %c0_7] : memref<128x128xf32, #tpu.memory_space<vmem>>, vector<128x128xf32>
    %c0_8 = arith.constant 0 : index
    %c0_9 = arith.constant 0 : index
    %10 = vector.load %arg5[%c0_8, %c0_9] : memref<1x128xf32, #tpu.memory_space<vmem>>, vector<1x128xf32>
    %11 = vector.extract_strided_slice %8 {offsets = [0, 0], sizes = [16, 128], strides = [1, 1]} : vector<16x256xf32> to vector<16x128xf32>
    %cst_10 = arith.constant dense<0.000000e+00> : vector<16x128xf32>
    %12 = tpu.matmul %5, %9, %cst_10 {dimension_numbers = #tpu.dot_dimension_numbers<[1], [0], [0], [1], [0, 0, 1, 1], [], []>} : vector<16x128xf32>, vector<128x128xf32>, vector<16x128xf32> -> vector<16x128xf32>
    %13 = arith.mulf %11, %5 : vector<16x128xf32>
    %cst_11 = arith.constant dense<0.000000e+00> : vector<16xf32>
    %14 = vector.multi_reduction <add>, %13, %cst_11 [1] : vector<16x128xf32> to vector<16xf32>
    %15 = vector.shape_cast %14 : vector<16xf32> to vector<16x1xf32>
    %16 = vector.broadcast %10 : vector<1x128xf32> to vector<16x128xf32>
    %17 = arith.addf %12, %16 : vector<16x128xf32>
    %18 = vector.broadcast %15 : vector<16x1xf32> to vector<16x128xf32>
    %19 = arith.addf %17, %18 : vector<16x128xf32>
    %cst_12 = arith.constant 0.000000e+00 : f32
    %20 = vector.broadcast %cst_12 : f32 to vector<16x128xf32>
    %21 = arith.maximumf %19, %20 : vector<16x128xf32>
    %c0_13 = arith.constant 0 : index
    %c0_14 = arith.constant 0 : index
    %22 = vector.load %arg6[%c0_13, %c0_14] : memref<128x128xf32, #tpu.memory_space<vmem>>, vector<128x128xf32>
    %c0_15 = arith.constant 0 : index
    %c0_16 = arith.constant 0 : index
    %23 = vector.load %arg7[%c0_15, %c0_16] : memref<1x128xf32, #tpu.memory_space<vmem>>, vector<1x128xf32>
    %24 = vector.extract_strided_slice %8 {offsets = [0, 128], sizes = [16, 128], strides = [1, 1]} : vector<16x256xf32> to vector<16x128xf32>
    %cst_17 = arith.constant dense<0.000000e+00> : vector<16x128xf32>
    %25 = tpu.matmul %21, %22, %cst_17 {dimension_numbers = #tpu.dot_dimension_numbers<[1], [0], [0], [1], [0, 0, 1, 1], [], []>} : vector<16x128xf32>, vector<128x128xf32>, vector<16x128xf32> -> vector<16x128xf32>
    %26 = arith.mulf %24, %21 : vector<16x128xf32>
    %cst_18 = arith.constant dense<0.000000e+00> : vector<16xf32>
    %27 = vector.multi_reduction <add>, %26, %cst_18 [1] : vector<16x128xf32> to vector<16xf32>
    %28 = vector.shape_cast %27 : vector<16xf32> to vector<16x1xf32>
    %29 = vector.broadcast %23 : vector<1x128xf32> to vector<16x128xf32>
    %30 = arith.addf %25, %29 : vector<16x128xf32>
    %31 = vector.broadcast %28 : vector<16x1xf32> to vector<16x128xf32>
    %32 = arith.addf %30, %31 : vector<16x128xf32>
    %c0_19 = arith.constant 0 : index
    %c0_20 = arith.constant 0 : index
    %33 = vector.load %arg8[%c0_19, %c0_20] : memref<16x128xf32, #tpu.memory_space<vmem>>, vector<16x128xf32>
    tpu.vector_store %arg8[%c0_19, %c0_20], %32 {strides = array<i32>} : memref<16x128xf32, #tpu.memory_space<vmem>>, vector<16x128xf32>,
    return
  }
  func.func @transform_0(%arg0: i32) -> (i32, i32) {
    %c0_i32 = arith.constant 0 : i32
    %c0_i32_0 = arith.constant 0 : i32
    return %arg0, %c0_i32 : i32, i32
  }
  func.func @transform_1(%arg0: i32) -> (i32, i32) {
    %c0_i32 = arith.constant 0 : i32
    %c0_i32_0 = arith.constant 0 : i32
    return %arg0, %c0_i32 : i32, i32
  }
  func.func @transform_2(%arg0: i32) -> (i32, i32) {
    %c0_i32 = arith.constant 0 : i32
    %c0_i32_0 = arith.constant 0 : i32
    %c0_i32_1 = arith.constant 0 : i32
    return %c0_i32, %c0_i32_0 : i32, i32
  }
  func.func @transform_3(%arg0: i32) -> (i32, i32) {
    %c0_i32 = arith.constant 0 : i32
    %c0_i32_0 = arith.constant 0 : i32
    %c0_i32_1 = arith.constant 0 : i32
    return %c0_i32, %c0_i32_0 : i32, i32
  }
  func.func @transform_4(%arg0: i32) -> (i32, i32) {
    %c0_i32 = arith.constant 0 : i32
    %c0_i32_0 = arith.constant 0 : i32
    %c0_i32_1 = arith.constant 0 : i32
    return %c0_i32, %c0_i32_0 : i32, i32
  }
  func.func @transform_5(%arg0: i32) -> (i32, i32) {
    %c0_i32 = arith.constant 0 : i32
    %c0_i32_0 = arith.constant 0 : i32
    %c0_i32_1 = arith.constant 0 : i32
    return %c0_i32, %c0_i32_0 : i32, i32
  }
  func.func @transform_6(%arg0: i32) -> (i32, i32) {
    %c0_i32 = arith.constant 0 : i32
    %c0_i32_0 = arith.constant 0 : i32
    %c0_i32_1 = arith.constant 0 : i32
    return %c0_i32, %c0_i32_0 : i32, i32
  }
  func.func @transform_7(%arg0: i32) -> (i32, i32) {
    %c0_i32 = arith.constant 0 : i32
    %c0_i32_0 = arith.constant 0 : i32
    return %arg0, %c0_i32 : i32, i32
  }
}

module attributes {stable_mosaic.version = 11 : i64} {
  func.func @_fused_ldr_kernel(%arg0: i32, %arg1: memref<16x128xf32, #tpu.memory_space<vmem>>, %arg2: memref<16x128xbf16, #tpu.memory_space<vmem>>, %arg3: memref<128x256xf32, #tpu.memory_space<vmem>>, %arg4: memref<128x128xf32, #tpu.memory_space<vmem>>, %arg5: memref<1x128xf32, #tpu.memory_space<vmem>>, %arg6: memref<128x128xf32, #tpu.memory_space<vmem>>, %arg7: memref<1x128xf32, #tpu.memory_space<vmem>>, %arg8: memref<16x128xf32, #tpu.memory_space<vmem>>) attributes {dimension_semantics = [#tpu.dimension_semantics<parallel>], iteration_bounds = array<i64: 1>, scalar_prefetch = 0 : i64, scratch_operands = 0 : i64, tpu.core_type = #tpu.core_type<tc>, window_params = [{transform_indices = @transform_0, window_bounds = array<i64: 16, 128>}, {transform_indices = @transform_1, window_bounds = array<i64: 16, 128>}, {pipeline_mode = #tpu.pipeline_mode<synchronous>, transform_indices = @transform_2, window_bounds = array<i64: 128, 256>}, {pipeline_mode = #tpu.pipeline_mode<synchronous>, transform_indices = @transform_3, window_bounds = array<i64: 128, 128>}, {pipeline_mode = #tpu.pipeline_mode<synchronous>, transform_indices = @transform_4, window_bounds = array<i64: 1, 128>}, {pipeline_mode = #tpu.pipeline_mode<synchronous>, transform_indices = @transform_5, window_bounds = array<i64: 128, 128>}, {pipeline_mode = #tpu.pipeline_mode<synchronous>, transform_indices = @transform_6, window_bounds = array<i64: 1, 128>}, {transform_indices = @transform_7, window_bounds = array<i64: 16, 128>}]} {
    %c0 = arith.constant 0 : index
    %c0_0 = arith.constant 0 : index
    %0 = vector.load %arg2[%c0, %c0_0] : memref<16x128xbf16, #tpu.memory_space<vmem>>, vector<16x128xbf16>
    %1 = arith.extf %0 : vector<16x128xbf16> to vector<16x128xf32>
    %c0_1 = arith.constant 0 : index
    %c0_2 = arith.constant 0 : index
    %2 = vector.load %arg1[%c0_1, %c0_2] : memref<16x128xf32, #tpu.memory_space<vmem>>, vector<16x128xf32>
    %cst = arith.constant 1.000000e+00 : f32
    %3 = vector.broadcast %cst : f32 to vector<16x128xf32>
    %4 = arith.subf %3, %1 : vector<16x128xf32>
    %5 = arith.mulf %2, %4 : vector<16x128xf32>
    %6 = arith.extf %0 : vector<16x128xbf16> to vector<16x128xf32>
    %c0_3 = arith.constant 0 : index
    %c0_4 = arith.constant 0 : index
    %7 = vector.load %arg3[%c0_3, %c0_4] : memref<128x256xf32, #tpu.memory_space<vmem>>, vector<128x256xf32>
    %cst_5 = arith.constant dense<0.000000e+00> : vector<16x256xf32>
    %8 = tpu.matmul %6, %7, %cst_5 {dimension_numbers = #tpu.dot_dimension_numbers<[1], [0], [0], [1], [0, 0, 1, 1], [], []>} : vector<16x128xf32>, vector<128x256xf32>, vector<16x256xf32> -> vector<16x256xf32>
    %c0_6 = arith.constant 0 : index
    %c0_7 = arith.constant 0 : index
    %9 = vector.load %arg4[%c0_6, %c0_7] : memref<128x128xf32, #tpu.memory_space<vmem>>, vector<128x128xf32>
    %c0_8 = arith.constant 0 : index
    %c0_9 = arith.constant 0 : index
    %10 = vector.load %arg5[%c0_8, %c0_9] : memref<1x128xf32, #tpu.memory_space<vmem>>, vector<1x128xf32>
    %11 = vector.extract_strided_slice %8 {offsets = [0, 0], sizes = [16, 128], strides = [1, 1]} : vector<16x256xf32> to vector<16x128xf32>
    %cst_10 = arith.constant dense<0.000000e+00> : vector<16x128xf32>
    %12 = tpu.matmul %5, %9, %cst_10 {dimension_numbers = #tpu.dot_dimension_numbers<[1], [0], [0], [1], [0, 0, 1, 1], [], []>} : vector<16x128xf32>, vector<128x128xf32>, vector<16x128xf32> -> vector<16x128xf32>
    %13 = arith.mulf %11, %5 : vector<16x128xf32>
    %cst_11 = arith.constant dense<0.000000e+00> : vector<16xf32>
    %14 = vector.multi_reduction <add>, %13, %cst_11 [1] : vector<16x128xf32> to vector<16xf32>
    %15 = vector.shape_cast %14 : vector<16xf32> to vector<16x1xf32>
    %16 = vector.broadcast %10 : vector<1x128xf32> to vector<16x128xf32>
    %17 = arith.addf %12, %16 : vector<16x128xf32>
    %18 = vector.broadcast %15 : vector<16x1xf32> to vector<16x128xf32>
    %19 = arith.addf %17, %18 : vector<16x128xf32>
    %cst_12 = arith.constant 0.000000e+00 : f32
    %20 = vector.broadcast %cst_12 : f32 to vector<16x128xf32>
    %21 = arith.maximumf %19, %20 : vector<16x128xf32>
    %c0_13 = arith.constant 0 : index
    %c0_14 = arith.constant 0 : index
    %22 = vector.load %arg6[%c0_13, %c0_14] : memref<128x128xf32, #tpu.memory_space<vmem>>, vector<128x128xf32>
    %c0_15 = arith.constant 0 : index
    %c0_16 = arith.constant 0 : index
    %23 = vector.load %arg7[%c0_15, %c0_16] : memref<1x128xf32, #tpu.memory_space<vmem>>, vector<1x128xf32>
    %24 = vector.extract_strided_slice %8 {offsets = [0, 128], sizes = [16, 128], strides = [1, 1]} : vector<16x256xf32> to vector<16x128xf32>
    %cst_17 = arith.constant dense<0.000000e+00> : vector<16x128xf32>
    %25 = tpu.matmul %21, %22, %cst_17 {dimension_numbers = #tpu.dot_dimension_numbers<[1], [0], [0], [1], [0, 0, 1, 1], [], []>} : vector<16x128xf32>, vector<128x128xf32>, vector<16x128xf32> -> vector<16x128xf32>
    %26 = arith.mulf %24, %21 : vector<16x128xf32>
    %cst_18 = arith.constant dense<0.000000e+00> : vector<16xf32>
    %27 = vector.multi_reduction <add>, %26, %cst_18 [1] : vector<16x128xf32> to vector<16xf32>
    %28 = vector.shape_cast %27 : vector<16xf32> to vector<16x1xf32>
    %29 = vector.broadcast %23 : vector<1x128xf32> to vector<16x128xf32>
    %30 = arith.addf %25, %29 : vector<16x128xf32>
    %31 = vector.broadcast %28 : vector<16x1xf32> to vector<16x128xf32>
    %32 = arith.addf %30, %31 : vector<16x128xf32>
    %c0_19 = arith.constant 0 : index
    %c0_20 = arith.constant 0 : index
    %33 = vector.load %arg8[%c0_19, %c0_20] : memref<16x128xf32, #tpu.memory_space<vmem>>, vector<16x128xf32>
    tpu.vector_store %arg8[%c0_19, %c0_20], %32 {strides = array<i32>} : memref<16x128xf32, #tpu.memory_space<vmem>>, vector<16x128xf32>,
    return
  }
  func.func @transform_0(%arg0: i32) -> (i32, i32) {
    %c0_i32 = arith.constant 0 : i32
    %c0_i32_0 = arith.constant 0 : i32
    return %arg0, %c0_i32 : i32, i32
  }
  func.func @transform_1(%arg0: i32) -> (i32, i32) {
    %c0_i32 = arith.constant 0 : i32
    %c0_i32_0 = arith.constant 0 : i32
    return %arg0, %c0_i32 : i32, i32
  }
  func.func @transform_2(%arg0: i32) -> (i32, i32) {
    %c0_i32 = arith.constant 0 : i32
    %c0_i32_0 = arith.constant 0 : i32
    %c0_i32_1 = arith.constant 0 : i32
    return %c0_i32, %c0_i32_0 : i32, i32
  }
  func.func @transform_3(%arg0: i32) -> (i32, i32) {
    %c0_i32 = arith.constant 0 : i32
    %c0_i32_0 = arith.constant 0 : i32
    %c0_i32_1 = arith.constant 0 : i32
    return %c0_i32, %c0_i32_0 : i32, i32
  }
  func.func @transform_4(%arg0: i32) -> (i32, i32) {
    %c0_i32 = arith.constant 0 : i32
    %c0_i32_0 = arith.constant 0 : i32
    %c0_i32_1 = arith.constant 0 : i32
    return %c0_i32, %c0_i32_0 : i32, i32
  }
  func.func @transform_5(%arg0: i32) -> (i32, i32) {
    %c0_i32 = arith.constant 0 : i32
    %c0_i32_0 = arith.constant 0 : i32
    %c0_i32_1 = arith.constant 0 : i32
    return %c0_i32, %c0_i32_0 : i32, i32
  }
  func.func @transform_6(%arg0: i32) -> (i32, i32) {
    %c0_i32 = arith.constant 0 : i32
    %c0_i32_0 = arith.constant 0 : i32
    %c0_i32_1 = arith.constant 0 : i32
    return %c0_i32, %c0_i32_0 : i32, i32
  }
  func.func @transform_7(%arg0: i32) -> (i32, i32) {
    %c0_i32 = arith.constant 0 : i32
    %c0_i32_0 = arith.constant 0 : i32
    return %arg0, %c0_i32 : i32, i32
  }
}

</mosaic_0001>

<bundles_post_ra>
// kernel: _forward_impl.1
= control target key start
LH: loop header
LB: loop body
LE: loop exit
PB: predicated region body
PF: predicated region fallthrough
CT: control target
= control target key end

     0   :  { %12 = vsyncpa [#allocation3], 0  ;;  %s819_s0 = inlined_call_operand.vmem [shape: f32[16,128], index: 0, kind: input, shape index: {}]   ;;  %s820_s1 = inlined_call_operand.vmem [shape: bf16[16,128], index: 1, kind: input, shape index: {}]   ;;  %s821_s2 = inlined_call_operand.hbm [shape: f32[128,256], index: 2, kind: input, shape index: {}]   ;;  %s822_s3 = inlined_call_operand.hbm [shape: f32[128,128], index: 3, kind: input, shape index: {}]   ;;  %s823_s4 = inlined_call_operand.vmem [shape: f32[1,128], index: 4, kind: input, shape index: {}]   ;;  %s824_s5 = inlined_call_operand.hbm [shape: f32[128,128], index: 5, kind: input, shape index: {}]   ;;  %s825_s6 = inlined_call_operand.vmem [shape: f32[1,128], index: 6, kind: input, shape index: {}]   ;;  %s826_s7 = inlined_call_operand.vmem [shape: f32[16,128], index: 7, kind: output, shape index: {}]  }
   0x1   :  { %13 = vsyncpa [#allocation5], 0  ;;  %s694_s24 = smov [#allocation4]   ;;  %s624_s28 = scalar_lea.hbm %s822_s3, 2048 }
   0x2   :  { %s35_s25 = sshll.u32 %s694_s24, 4  ;;  %p625_p0 = scmp.ne.s32.totalorder %s822_s3, %s624_s28  ;;  %s36_s25 = int_to_ptr.vmem [resolvable:$true] %s35_s25 }
   0x3   :  { %p628_p1 = scmp.lt.u32.totalorder %s624_s28, %s822_s3 }
   0x5   :  { %p630_p2 = pnand %p628_p1, %p625_p0 }
   0x7   :  { %633 = shalt.err (!%p630_p2)
}
   0x8   :  { %s634_s10 = scalar_lea.vmem %s36_s25, 2048  ;;  %p639_p4 = scmp.lt.s32.totalorder %s36_s25, %s36_s25 }
   0x9   :  { %p635_p3 = scmp.ne.s32.totalorder %s36_s25, %s634_s10  ;;  %p640_p5 = scmp.lt.s32.totalorder %s634_s10, %s634_s10 }
   0xb   :  { %p641_p6 = por %p640_p5, %p639_p4 }
   0xd   :  { %p642_p7 = pnand %p641_p6, %p635_p3 }
   0xf   :  { %645 = shalt.err (!%p642_p7)
}
  0x10   :  { %s695_s11 = smov 128   ;;  %s696_s12 = smov 8  }
  0x11   :  { %41 = dma.hbm_to_vmem [thread:$0]  %s822_s3, 2048, %s36_s25, [#allocation5], %s695_s11, %s695_s11, %s696_s12  }
  0x12   :  { %s697_s15 = smov [#allocation2]   ;;  %s646_s19 = scalar_lea.hbm %s821_s2, 4096 }
  0x13   :  { %s23_s16 = sshll.u32 %s697_s15, 4  ;;  %p647_p8 = scmp.ne.s32.totalorder %s821_s2, %s646_s19  ;;  %s24_s16 = int_to_ptr.vmem [resolvable:$true] %s23_s16 }
  0x14   :  { %p650_p9 = scmp.lt.u32.totalorder %s646_s19, %s821_s2 }
  0x16   :  { %p652_p10 = pnand %p650_p9, %p647_p8 }
  0x18   :  { %655 = shalt.err (!%p652_p10)
}
  0x19   :  { %s656_s24 = scalar_lea.vmem %s24_s16, 4096  ;;  %p661_p12 = scmp.lt.s32.totalorder %s24_s16, %s24_s16 }
  0x1a   :  { %p657_p11 = scmp.ne.s32.totalorder %s24_s16, %s656_s24  ;;  %p662_p13 = scmp.lt.s32.totalorder %s656_s24, %s656_s24 }
  0x1c   :  { %p663_p0 = por %p662_p13, %p661_p12 }
  0x1e   :  { %p664_p1 = pnand %p663_p0, %p657_p11 }
  0x20   :  { %667 = shalt.err (!%p664_p1)
}
  0x21   :  { %s698_s3 = smov 256   ;;  %s699_s25 = smov 16  }
  0x22   :  { %29 = dma.hbm_to_vmem [thread:$0]  %s821_s2, 4096, %s24_s16, [#allocation3], %s698_s3, %s698_s3, %s699_s25  }
  0x23   :  { %s700_s28 = smov [#allocation6]   ;;  %s668_s9 = scalar_lea.hbm %s824_s5, 2048 }
  0x24   :  { %s49_s29 = sshll.u32 %s700_s28, 4  ;;  %p669_p2 = scmp.ne.s32.totalorder %s824_s5, %s668_s9  ;;  %s50_s29 = int_to_ptr.vmem [resolvable:$true] %s49_s29 }
  0x25   :  { %p672_p3 = scmp.lt.u32.totalorder %s668_s9, %s824_s5 }
  0x27   :  { %p674_p4 = pnand %p672_p3, %p669_p2 }
  0x29   :  { %677 = shalt.err (!%p674_p4)
}
  0x2a   :  { %s678_s17 = scalar_lea.vmem %s50_s29, 2048  ;;  %p683_p6 = scmp.lt.s32.totalorder %s50_s29, %s50_s29 }
  0x2b   :  { %p679_p5 = scmp.ne.s32.totalorder %s50_s29, %s678_s17  ;;  %p684_p7 = scmp.lt.s32.totalorder %s678_s17, %s678_s17 }
  0x2d   :  { %p685_p8 = por %p684_p7, %p683_p6 }
  0x2f   :  { %p686_p9 = pnand %p685_p8, %p679_p5 }
  0x31   :  { %689 = shalt.err (!%p686_p9)
}
  0x32   :  { %55 = dma.hbm_to_vmem [thread:$0]  %s824_s5, 2048, %s50_s29, [#allocation5], %s695_s11, %s695_s11, %s696_s12  }
  0x33   :  { %690 = dma.done.wait [#allocation3], 4096  }
  0x34   :  { %691 = vsyncadd [#allocation3], 4294963200 }
  0x35   :  { %692 = dma.done.wait [#allocation5], 4096  }
  0x36   :  { %693 = vsyncadd [#allocation5], 4294963200  ;;  %v701_v0 = vmov 0.0   ;;  %v78_v1 = vld [vmem:[#allocation2 + $0x8] sm:$0xff]  ;;  %v80_v2 = vld [vmem:[#allocation2 + $0x18] sm:$0xff] }
  0x37   :  { %173 = vmatprep.mubr.f32.mxu0 %v701_v0  ;;  %v77_v3 = vld [vmem:[#allocation2] sm:$0xff]  ;;  %v520_v4 = vpack.c.bf16 %v80_v2, %v78_v1  ;;  %v79_v5 = vld [vmem:[#allocation2 + $0x10] sm:$0xff]  ;;  %v82_v6 = vld [vmem:[#allocation2 + $0x28] sm:$0xff] }
  0x38   :  { %v84_v7 = vld [vmem:[#allocation2 + $0x38] sm:$0xff]  ;;  %v522_v8 = vpack.c.bf16 %v79_v5, %v77_v3  ;;  %v81_v10 = vld [vmem:[#allocation2 + $0x20] sm:$0xff]  ;;  %v83_v11 = vld [vmem:[#allocation2 + $0x30] sm:$0xff] }
  0x39   :  { %v524_v9 = vpack.c.bf16 %v84_v7, %v82_v6  ;;  %v86_v12 = vld [vmem:[#allocation2 + $0x48] sm:$0xff]  ;;  %521 = vmatprep.subr.bf16.mxu0 %v520_v4  ;;  %v88_v13 = vld [vmem:[#allocation2 + $0x58] sm:$0xff]  ;;  %v526_v14 = vpack.c.bf16 %v83_v11, %v81_v10  ;;  %v85_v16 = vld [vmem:[#allocation2 + $0x40] sm:$0xff] }
  0x3a   :  { %523 = vmatpush1.bf16.msra.mxu0 %v522_v8  ;;  %v528_v15 = vpack.c.bf16 %v88_v13, %v86_v12  ;;  %v87_v17 = vld [vmem:[#allocation2 + $0x50] sm:$0xff]  ;;  %v90_v18 = vld [vmem:[#allocation2 + $0x68] sm:$0xff]  ;;  %v92_v19 = vld [vmem:[#allocation2 + $0x78] sm:$0xff] }
  0x3b   :  { %525 = vmatprep.subr.bf16.mxu0 %v524_v9  ;;  %v530_v20 = vpack.c.bf16 %v87_v17, %v85_v16  ;;  %v532_v21 = vpack.c.bf16 %v92_v19, %v90_v18  ;;  %v89_v22 = vld [vmem:[#allocation2 + $0x60] sm:$0xff]  ;;  %v91_v23 = vld [vmem:[#allocation2 + $0x70] sm:$0xff]  ;;  %v94_v24 = vld [vmem:[#allocation2 + $0x88] sm:$0xff] }
  0x3c   :  { %v96_v25 = vld [vmem:[#allocation2 + $0x98] sm:$0xff]  ;;  %v788_v26 = vld [vmem:[%s820_s1] sm:$0xff]   ;;  %v187_v29 = vld [vmem:[#allocation4 + $0x8] sm:$0xff]  ;;  %v534_v31 = vpack.c.bf16 %v91_v23, %v89_v22 }
  0x3d   :  { %v412_v27 = vunpack.c.l.bf16 %v788_v26  ;;  %v186_v28 = vld [vmem:[#allocation4] sm:$0xff]  ;;  %v188_v30 = vld [vmem:[#allocation4 + $0x10] sm:$0xff]  ;;  %v189_v34 = vld [vmem:[#allocation4 + $0x18] sm:$0xff]  ;;  %v536_v35 = vpack.c.bf16 %v96_v25, %v94_v24 }
  0x3e   :  { %527 = vmatpush1.bf16.msra.mxu0 %v526_v14  ;;  %v93_v32 = vld [vmem:[#allocation2 + $0x80] sm:$0xff]  ;;  %v552_v33 = vpack.c.bf16 %v187_v29, %v186_v28  ;;  %v95_v36 = vld [vmem:[#allocation2 + $0x90] sm:$0xff]  ;;  %v556_v37 = vpack.c.bf16 %v189_v34, %v188_v30  ;;  %v191_v39 = vld [vmem:[#allocation4 + $0x28] sm:$0xff]  ;;  %v413_v14 = vunpack.c.h.bf16 %v788_v26 }
  0x3f   :  { %529 = vmatprep.subr.bf16.mxu0 %v528_v15  ;;  %v190_v38 = vld [vmem:[#allocation4 + $0x20] sm:$0xff]  ;;  %v73_v40 = vsub.f32 1.0, %v412_v27  ;;  %v98_v41 = vld [vmem:[#allocation2 + $0xa8] sm:$0xff]  ;;  %v100_v42 = vld [vmem:[#allocation2 + $0xb8] sm:$0xff]  ;;  %v538_v43 = vpack.c.bf16 %v95_v36, %v93_v32 }
  0x40   :  { %553 = vmatprep.subr.bf16.mxu1 %v552_v33  ;;  %v97_v44 = vld [vmem:[#allocation2 + $0xa0] sm:$0xff]  ;;  %v560_v45 = vpack.c.bf16 %v191_v39, %v190_v38  ;;  %v540_v47 = vpack.c.bf16 %v100_v42, %v98_v41  ;;  %v99_v48 = vld [vmem:[#allocation2 + $0xb0] sm:$0xff]  ;;  %v193_v50 = vld [vmem:[#allocation4 + $0x38] sm:$0xff]  ;;  %v74_v16 = vsub.f32 1.0, %v413_v14 }
  0x41   :  { %555 = vmatpush3.bf16.msra.mxu1 %v552_v33  ;;  %v71_v46 = vld [vmem:[%s819_s0] sm:$0xff]  ;;  %v192_v49 = vld [vmem:[#allocation4 + $0x30] sm:$0xff]  ;;  %v102_v52 = vld [vmem:[#allocation2 + $0xc8] sm:$0xff]  ;;  %v542_v54 = vpack.c.bf16 %v99_v48, %v97_v44 }
  0x42   :  { %531 = vmatpush1.bf16.msra.mxu0 %v530_v20  ;;  %557 = vmatprep.subr.bf16.mxu1 %v556_v37  ;;  %v796_v51 = vmul.f32 %v73_v40, %v71_v46  ;;  %v104_v53 = vld [vmem:[#allocation2 + $0xd8] sm:$0xff]  ;;  %v101_v55 = vld [vmem:[#allocation2 + $0xc0] sm:$0xff]  ;;  %v564_v56 = vpack.c.bf16 %v193_v50, %v192_v49  ;;  %v103_v58 = vld [vmem:[#allocation2 + $0xd0] sm:$0xff] }
  0x43   :  { %533 = vmatprep.subr.bf16.mxu0 %v532_v21  ;;  %v544_v57 = vpack.c.bf16 %v104_v53, %v102_v52  ;;  %v194_v59 = vld [vmem:[#allocation4 + $0x40] sm:$0xff]  ;;  %v195_v60 = vld [vmem:[#allocation4 + $0x48] sm:$0xff]  ;;  %v108_v62 = vld [vmem:[#allocation2 + $0xf8] sm:$0xff]  ;;  %v546_v63 = vpack.c.bf16 %v103_v58, %v101_v55 }
  0x44   :  { %482 = vmatprep.mubr.f32.mxu1 %v796_v51  ;;  %v106_v61 = vld [vmem:[#allocation2 + $0xe8] sm:$0xff]  ;;  %v105_v1 = vld [vmem:[#allocation2 + $0xe0] sm:$0xff]  ;;  %v568_v2 = vpack.c.bf16 %v195_v60, %v194_v59  ;;  %v107_v4 = vld [vmem:[#allocation2 + $0xf0] sm:$0xff] }
  0x45   :  { %559 = vmatpush3.bf16.msra.mxu1 %v556_v37  ;;  %v548_v3 = vpack.c.bf16 %v108_v62, %v106_v61  ;;  %v196_v5 = vld [vmem:[#allocation4 + $0x50] sm:$0xff]  ;;  %v197_v6 = vld [vmem:[#allocation4 + $0x58] sm:$0xff]  ;;  %v550_v7 = vpack.c.bf16 %v107_v4, %v105_v1  ;;  %v198_v9 = vld [vmem:[#allocation4 + $0x60] sm:$0xff] }
  0x46   :  { %535 = vmatpush1.bf16.msra.mxu0 %v534_v31  ;;  %561 = vmatprep.subr.bf16.mxu1 %v560_v45  ;;  %v572_v8 = vpack.c.bf16 %v197_v6, %v196_v5  ;;  %v199_v10 = vld [vmem:[#allocation4 + $0x68] sm:$0xff]  ;;  %v200_v12 = vld [vmem:[#allocation4 + $0x70] sm:$0xff]  ;;  %v201_v13 = vld [vmem:[#allocation4 + $0x78] sm:$0xff] }
  0x47   :  { %537 = vmatprep.subr.bf16.mxu0 %v536_v35  ;;  %v576_v11 = vpack.c.bf16 %v199_v10, %v198_v9  ;;  %v580_v15 = vpack.c.bf16 %v201_v13, %v200_v12  ;;  %v72_v17 = vld [vmem:[%s819_s0 + $0x8] sm:$0xff]  ;;  %v294_v19 = vld [vmem:[#allocation6] sm:$0xff]  ;;  %v296_v21 = vld [vmem:[#allocation6 + $0x10] sm:$0xff] }
  0x48   :  { %v76_v18 = vmul.f32 %v74_v16, %v72_v17  ;;  %v295_v20 = vld [vmem:[#allocation6 + $0x8] sm:$0xff]  ;;  %v297_v23 = vld [vmem:[#allocation6 + $0x18] sm:$0xff]  ;;  %v302_v30 = vld [vmem:[#allocation6 + $0x40] sm:$0xff] }
  0x49   :  { %563 = vmatpush3.bf16.msra.mxu1 %v560_v45  ;;  %v584_v22 = vpack.c.bf16 %v295_v20, %v294_v19  ;;  %v588_v24 = vpack.c.bf16 %v297_v23, %v296_v21  ;;  %v299_v25 = vld [vmem:[#allocation6 + $0x28] sm:$0xff]  ;;  %v301_v28 = vld [vmem:[#allocation6 + $0x38] sm:$0xff]  ;;  %v304_v33 = vld [vmem:[#allocation6 + $0x50] sm:$0xff] }
  0x4a   :  { %539 = vmatpush1.bf16.msra.mxu0 %v538_v43  ;;  %565 = vmatprep.subr.bf16.mxu1 %v564_v56  ;;  %v303_v31 = vld [vmem:[#allocation6 + $0x48] sm:$0xff]  ;;  %v305_v34 = vld [vmem:[#allocation6 + $0x58] sm:$0xff]  ;;  %v306_v44 = vld [vmem:[#allocation6 + $0x60] sm:$0xff] }
  0x4b   :  { %541 = vmatprep.subr.bf16.mxu0 %v540_v47  ;;  %v600_v32 = vpack.c.bf16 %v303_v31, %v302_v30  ;;  %v604_v35 = vpack.c.bf16 %v305_v34, %v304_v33  ;;  %v307_v45 = vld [vmem:[#allocation6 + $0x68] sm:$0xff]  ;;  %v308_v47 = vld [vmem:[#allocation6 + $0x70] sm:$0xff]  ;;  %v309_v48 = vld [vmem:[#allocation6 + $0x78] sm:$0xff] }
  0x4c   :  { %v608_v46 = vpack.c.bf16 %v307_v45, %v306_v44  ;;  %v612_v49 = vpack.c.bf16 %v309_v48, %v308_v47  ;;  %v408_v50 = vld [vmem:[%s823_s4] ss:$0 sm:$0xff] }
  0x4d   :  { %567 = vmatpush3.bf16.msra.mxu1 %v564_v56  ;;  %v409_v62 = vld [vmem:[%s825_s6] ss:$0 sm:$0xff] }
  0x4e   :  { %543 = vmatpush1.bf16.msra.mxu0 %v542_v54  ;;  %569 = vmatprep.subr.bf16.mxu1 %v568_v2 }
  0x4f   :  { %545 = vmatprep.subr.bf16.mxu0 %v544_v57 }
  0x51   :  { %571 = vmatpush3.bf16.msra.mxu1 %v568_v2 }
  0x52   :  { %547 = vmatpush1.bf16.msra.mxu0 %v546_v63  ;;  %573 = vmatprep.subr.bf16.mxu1 %v572_v8 }
  0x53   :  { %549 = vmatprep.subr.bf16.mxu0 %v548_v3 }
  0x55   :  { %575 = vmatpush3.bf16.msra.mxu1 %v572_v8 }
  0x56   :  { %551 = vmatpush1.bf16.msra.mxu0 %v550_v7  ;;  %577 = vmatprep.subr.bf16.mxu1 %v576_v11 }
  0x57   :  { %585 = vmatprep.subr.bf16.mxu0 %v584_v22 }
  0x59   :  { %174 = vmatmul.mubr.f32.vlgmr.msra.gmra.mrb[0].mxu0 %v412_v27  ;;  %579 = vmatpush3.bf16.msra.mxu1 %v576_v11  ;;  %v300_v27 = vld [vmem:[#allocation6 + $0x30] sm:$0xff] }
  0x5a   :  { %179 = vmatprep.mubr.f32.mxu0 %v701_v0  ;;  %581 = vmatprep.subr.bf16.mxu1 %v580_v15  ;;  %v298_v0 = vld [vmem:[#allocation6 + $0x20] sm:$0xff]  ;;  %v596_v29 = vpack.c.bf16 %v301_v28, %v300_v27 }
  0x5b   :  { %587 = vmatpush3.bf16.msra.mxu0 %v584_v22  ;;  %v592_v26 = vpack.c.bf16 %v299_v25, %v298_v0 }
  0x5c   :  { %589 = vmatprep.subr.bf16.mxu0 %v588_v24 }
  0x5d   :  { %180 = vmatmul.mubr.f32.gmra.mrb[2].mxu0 %v413_v14  ;;  %583 = vmatpush3.bf16.msra.mxu1 %v580_v15 }
  0x5f   :  { %591 = vmatpush3.bf16.msra.mxu0 %v588_v24 }
  0x60   :  { %483 = vmatmul.mubr.f32.vlgmr.msra.gmra.mrb[0].mxu1 %v76_v18  ;;  %593 = vmatprep.subr.bf16.mxu0 %v592_v26 }
  0x63   :  { %595 = vmatpush3.bf16.msra.mxu0 %v592_v26 }
  0x64   :  { %597 = vmatprep.subr.bf16.mxu0 %v596_v29 }
  0x67   :  { %599 = vmatpush3.bf16.msra.mxu0 %v596_v29 }
  0x68   :  { %601 = vmatprep.subr.bf16.mxu0 %v600_v32 }
  0x6b   :  { %603 = vmatpush3.bf16.msra.mxu0 %v600_v32 }
  0x6c   :  { %605 = vmatprep.subr.bf16.mxu0 %v604_v35 }
  0x6f   :  { %607 = vmatpush3.bf16.msra.mxu0 %v604_v35 }
  0x70   :  { %609 = vmatprep.subr.bf16.mxu0 %v608_v46 }
  0x73   :  { %611 = vmatpush3.bf16.msra.mxu0 %v608_v46 }
  0x74   :  { %613 = vmatprep.subr.bf16.mxu0 %v612_v49 }
  0x77   :  { %615 = vmatpush3.bf16.msra.mxu0 %v612_v49 }
 0x12c   :  { %v175_v36 = vpop.f32.mrb[0].mxu0 }
 0x12d   :  { %v177_v37 = vpop.f32.mrb[1].mxu0  ;;  %v203_v38 = vmul.f32 %v175_v36, %v796_v51 }
 0x12f   :  { %205 = vadd.xlane.f32.xlu0 %v203_v38 }
 0x130   :  { %v181_v39 = vpop.f32.mrb[2].mxu0 }
 0x131   :  { %v204_v40 = vmul.f32 %v181_v39, %v76_v18  ;;  %v183_v41 = vpop.f32.mrb[3].mxu0 }
 0x133   :  { %207 = vadd.xlane.f32.xlu0 %v204_v40  ;;  %v484_v42 = vpop.f32.mrb[0].mxu1 }
 0x134   :  { %v281_v43 = vpop.f32.mrb[1].mxu1  ;;  %v287_v54 = vadd.f32 %v484_v42, %v408_v50 }
 0x135   :  { %v282_v51 = vadd.f32 %v408_v50, %v281_v43 }
 0x1bc   :  { %v206_v52 = vpop.xlane.xlu0 %205 }
 0x1bd   :  { %v290_v53 = vadd.f32 %v282_v51, %v206_v52 }
 0x1bf   :  { %v292_v55 = vmax.f32 %v290_v53, 0.0 }
 0x1c0   :  { %v208_v56 = vpop.xlane.xlu0 %207 }
 0x1c1   :  { %v291_v57 = vadd.f32 %v287_v54, %v208_v56  ;;  %517 = vmatprep.mubr.f32.mxu0 %v292_v55  ;;  %v311_v58 = vmul.f32 %v292_v55, %v177_v37 }
 0x1c3   :  { %v293_v59 = vmax.f32 %v291_v57, 0.0  ;;  %313 = vadd.xlane.f32.xlu1 %v311_v58 }
 0x1c5   :  { %518 = vmatmul.mubr.f32.vlgmr.msra.gmra.mrb[4].mxu0 %v293_v59  ;;  %v312_v60 = vmul.f32 %v293_v59, %v183_v41 }
 0x1c7   :  { %315 = vadd.xlane.f32.xlu1 %v312_v60 }
 0x250   :  { %v314_v61 = vpop.xlane.xlu1 %313 }
 0x254   :  { %v316_v3 = vpop.xlane.xlu1 %315 }
 0x298   :  { %v519_v63 = vpop.f32.mrb[4].mxu0 }
 0x299   :  { %v395_v1 = vadd.f32 %v519_v63, %v409_v62  ;;  %v389_v2 = vpop.f32.mrb[5].mxu0 }
 0x29a   :  { %v390_v4 = vadd.f32 %v409_v62, %v389_v2 }
 0x29b   :  { %v399_v5 = vadd.f32 %v395_v1, %v316_v3 }
 0x29c   :  { %v398_v6 = vadd.f32 %v390_v4, %v314_v61 }
 0x29d   :  { %401 = vst [vmem:[%s826_s7 + $0x8] sm:$0xff] %v399_v5 }
 0x29e   :  { %400 = vst [vmem:[%s826_s7] sm:$0xff] %v398_v6 }
 0x29f   :  { %406 = vsyncpa [#allocation3], 1 }
 0x2a0   :  { %407 = vsyncpa [#allocation5], 1 }

// kernel: _forward_impl.1
= control target key start
LH: loop header
LB: loop body
LE: loop exit
PB: predicated region body
PF: predicated region fallthrough
CT: control target
= control target key end

     0   :  { %12 = vsyncpa [#allocation3], 0  ;;  %s819_s0 = inlined_call_operand.vmem [shape: f32[16,128], index: 0, kind: input, shape index: {}]   ;;  %s820_s1 = inlined_call_operand.vmem [shape: bf16[16,128], index: 1, kind: input, shape index: {}]   ;;  %s821_s2 = inlined_call_operand.hbm [shape: f32[128,256], index: 2, kind: input, shape index: {}]   ;;  %s822_s3 = inlined_call_operand.hbm [shape: f32[128,128], index: 3, kind: input, shape index: {}]   ;;  %s823_s4 = inlined_call_operand.vmem [shape: f32[1,128], index: 4, kind: input, shape index: {}]   ;;  %s824_s5 = inlined_call_operand.hbm [shape: f32[128,128], index: 5, kind: input, shape index: {}]   ;;  %s825_s6 = inlined_call_operand.vmem [shape: f32[1,128], index: 6, kind: input, shape index: {}]   ;;  %s826_s7 = inlined_call_operand.vmem [shape: f32[16,128], index: 7, kind: output, shape index: {}]  }
   0x1   :  { %13 = vsyncpa [#allocation5], 0  ;;  %s694_s24 = smov [#allocation4]   ;;  %s624_s28 = scalar_lea.hbm %s822_s3, 2048 }
   0x2   :  { %s35_s25 = sshll.u32 %s694_s24, 4  ;;  %p625_p0 = scmp.ne.s32.totalorder %s822_s3, %s624_s28  ;;  %s36_s25 = int_to_ptr.vmem [resolvable:$true] %s35_s25 }
   0x3   :  { %p628_p1 = scmp.lt.u32.totalorder %s624_s28, %s822_s3 }
   0x5   :  { %p630_p2 = pnand %p628_p1, %p625_p0 }
   0x7   :  { %633 = shalt.err (!%p630_p2)
}
   0x8   :  { %s634_s10 = scalar_lea.vmem %s36_s25, 2048  ;;  %p639_p4 = scmp.lt.s32.totalorder %s36_s25, %s36_s25 }
   0x9   :  { %p635_p3 = scmp.ne.s32.totalorder %s36_s25, %s634_s10  ;;  %p640_p5 = scmp.lt.s32.totalorder %s634_s10, %s634_s10 }
   0xb   :  { %p641_p6 = por %p640_p5, %p639_p4 }
   0xd   :  { %p642_p7 = pnand %p641_p6, %p635_p3 }
   0xf   :  { %645 = shalt.err (!%p642_p7)
}
  0x10   :  { %s695_s11 = smov 128   ;;  %s696_s12 = smov 8  }
  0x11   :  { %41 = dma.hbm_to_vmem [thread:$0]  %s822_s3, 2048, %s36_s25, [#allocation5], %s695_s11, %s695_s11, %s696_s12  }
  0x12   :  { %s697_s15 = smov [#allocation2]   ;;  %s646_s19 = scalar_lea.hbm %s821_s2, 4096 }
  0x13   :  { %s23_s16 = sshll.u32 %s697_s15, 4  ;;  %p647_p8 = scmp.ne.s32.totalorder %s821_s2, %s646_s19  ;;  %s24_s16 = int_to_ptr.vmem [resolvable:$true] %s23_s16 }
  0x14   :  { %p650_p9 = scmp.lt.u32.totalorder %s646_s19, %s821_s2 }
  0x16   :  { %p652_p10 = pnand %p650_p9, %p647_p8 }
  0x18   :  { %655 = shalt.err (!%p652_p10)
}
  0x19   :  { %s656_s24 = scalar_lea.vmem %s24_s16, 4096  ;;  %p661_p12 = scmp.lt.s32.totalorder %s24_s16, %s24_s16 }
  0x1a   :  { %p657_p11 = scmp.ne.s32.totalorder %s24_s16, %s656_s24  ;;  %p662_p13 = scmp.lt.s32.totalorder %s656_s24, %s656_s24 }
  0x1c   :  { %p663_p0 = por %p662_p13, %p661_p12 }
  0x1e   :  { %p664_p1 = pnand %p663_p0, %p657_p11 }
  0x20   :  { %667 = shalt.err (!%p664_p1)
}
  0x21   :  { %s698_s3 = smov 256   ;;  %s699_s25 = smov 16  }
  0x22   :  { %29 = dma.hbm_to_vmem [thread:$0]  %s821_s2, 4096, %s24_s16, [#allocation3], %s698_s3, %s698_s3, %s699_s25  }
  0x23   :  { %s700_s28 = smov [#allocation6]   ;;  %s668_s9 = scalar_lea.hbm %s824_s5, 2048 }
  0x24   :  { %s49_s29 = sshll.u32 %s700_s28, 4  ;;  %p669_p2 = scmp.ne.s32.totalorder %s824_s5, %s668_s9  ;;  %s50_s29 = int_to_ptr.vmem [resolvable:$true] %s49_s29 }
  0x25   :  { %p672_p3 = scmp.lt.u32.totalorder %s668_s9, %s824_s5 }
  0x27   :  { %p674_p4 = pnand %p672_p3, %p669_p2 }
  0x29   :  { %677 = shalt.err (!%p674_p4)
}
  0x2a   :  { %s678_s17 = scalar_lea.vmem %s50_s29, 2048  ;;  %p683_p6 = scmp.lt.s32.totalorder %s50_s29, %s50_s29 }
  0x2b   :  { %p679_p5 = scmp.ne.s32.totalorder %s50_s29, %s678_s17  ;;  %p684_p7 = scmp.lt.s32.totalorder %s678_s17, %s678_s17 }
  0x2d   :  { %p685_p8 = por %p684_p7, %p683_p6 }
  0x2f   :  { %p686_p9 = pnand %p685_p8, %p679_p5 }
  0x31   :  { %689 = shalt.err (!%p686_p9)
}
  0x32   :  { %55 = dma.hbm_to_vmem [thread:$0]  %s824_s5, 2048, %s50_s29, [#allocation5], %s695_s11, %s695_s11, %s696_s12  }
  0x33   :  { %690 = dma.done.wait [#allocation3], 4096  }
  0x34   :  { %691 = vsyncadd [#allocation3], 4294963200 }
  0x35   :  { %692 = dma.done.wait [#allocation5], 4096  }
  0x36   :  { %693 = vsyncadd [#allocation5], 4294963200  ;;  %v701_v0 = vmov 0.0   ;;  %v78_v1 = vld [vmem:[#allocation2 + $0x8] sm:$0xff]  ;;  %v80_v2 = vld [vmem:[#allocation2 + $0x18] sm:$0xff] }
  0x37   :  { %173 = vmatprep.mubr.f32.mxu0 %v701_v0  ;;  %v77_v3 = vld [vmem:[#allocation2] sm:$0xff]  ;;  %v520_v4 = vpack.c.bf16 %v80_v2, %v78_v1  ;;  %v79_v5 = vld [vmem:[#allocation2 + $0x10] sm:$0xff]  ;;  %v82_v6 = vld [vmem:[#allocation2 + $0x28] sm:$0xff] }
  0x38   :  { %v84_v7 = vld [vmem:[#allocation2 + $0x38] sm:$0xff]  ;;  %v522_v8 = vpack.c.bf16 %v79_v5, %v77_v3  ;;  %v81_v10 = vld [vmem:[#allocation2 + $0x20] sm:$0xff]  ;;  %v83_v11 = vld [vmem:[#allocation2 + $0x30] sm:$0xff] }
  0x39   :  { %v524_v9 = vpack.c.bf16 %v84_v7, %v82_v6  ;;  %v86_v12 = vld [vmem:[#allocation2 + $0x48] sm:$0xff]  ;;  %521 = vmatprep.subr.bf16.mxu0 %v520_v4  ;;  %v88_v13 = vld [vmem:[#allocation2 + $0x58] sm:$0xff]  ;;  %v526_v14 = vpack.c.bf16 %v83_v11, %v81_v10  ;;  %v85_v16 = vld [vmem:[#allocation2 + $0x40] sm:$0xff] }
  0x3a   :  { %523 = vmatpush1.bf16.msra.mxu0 %v522_v8  ;;  %v528_v15 = vpack.c.bf16 %v88_v13, %v86_v12  ;;  %v87_v17 = vld [vmem:[#allocation2 + $0x50] sm:$0xff]  ;;  %v90_v18 = vld [vmem:[#allocation2 + $0x68] sm:$0xff]  ;;  %v92_v19 = vld [vmem:[#allocation2 + $0x78] sm:$0xff] }
  0x3b   :  { %525 = vmatprep.subr.bf16.mxu0 %v524_v9  ;;  %v530_v20 = vpack.c.bf16 %v87_v17, %v85_v16  ;;  %v532_v21 = vpack.c.bf16 %v92_v19, %v90_v18  ;;  %v89_v22 = vld [vmem:[#allocation2 + $0x60] sm:$0xff]  ;;  %v91_v23 = vld [vmem:[#allocation2 + $0x70] sm:$0xff]  ;;  %v94_v24 = vld [vmem:[#allocation2 + $0x88] sm:$0xff] }
  0x3c   :  { %v96_v25 = vld [vmem:[#allocation2 + $0x98] sm:$0xff]  ;;  %v788_v26 = vld [vmem:[%s820_s1] sm:$0xff]   ;;  %v187_v29 = vld [vmem:[#allocation4 + $0x8] sm:$0xff]  ;;  %v534_v31 = vpack.c.bf16 %v91_v23, %v89_v22 }
  0x3d   :  { %v412_v27 = vunpack.c.l.bf16 %v788_v26  ;;  %v186_v28 = vld [vmem:[#allocation4] sm:$0xff]  ;;  %v188_v30 = vld [vmem:[#allocation4 + $0x10] sm:$0xff]  ;;  %v189_v34 = vld [vmem:[#allocation4 + $0x18] sm:$0xff]  ;;  %v536_v35 = vpack.c.bf16 %v96_v25, %v94_v24 }
  0x3e   :  { %527 = vmatpush1.bf16.msra.mxu0 %v526_v14  ;;  %v93_v32 = vld [vmem:[#allocation2 + $0x80] sm:$0xff]  ;;  %v552_v33 = vpack.c.bf16 %v187_v29, %v186_v28  ;;  %v95_v36 = vld [vmem:[#allocation2 + $0x90] sm:$0xff]  ;;  %v556_v37 = vpack.c.bf16 %v189_v34, %v188_v30  ;;  %v191_v39 = vld [vmem:[#allocation4 + $0x28] sm:$0xff]  ;;  %v413_v14 = vunpack.c.h.bf16 %v788_v26 }
  0x3f   :  { %529 = vmatprep.subr.bf16.mxu0 %v528_v15  ;;  %v190_v38 = vld [vmem:[#allocation4 + $0x20] sm:$0xff]  ;;  %v73_v40 = vsub.f32 1.0, %v412_v27  ;;  %v98_v41 = vld [vmem:[#allocation2 + $0xa8] sm:$0xff]  ;;  %v100_v42 = vld [vmem:[#allocation2 + $0xb8] sm:$0xff]  ;;  %v538_v43 = vpack.c.bf16 %v95_v36, %v93_v32 }
  0x40   :  { %553 = vmatprep.subr.bf16.mxu1 %v552_v33  ;;  %v97_v44 = vld [vmem:[#allocation2 + $0xa0] sm:$0xff]  ;;  %v560_v45 = vpack.c.bf16 %v191_v39, %v190_v38  ;;  %v540_v47 = vpack.c.bf16 %v100_v42, %v98_v41  ;;  %v99_v48 = vld [vmem:[#allocation2 + $0xb0] sm:$0xff]  ;;  %v193_v50 = vld [vmem:[#allocation4 + $0x38] sm:$0xff]  ;;  %v74_v16 = vsub.f32 1.0, %v413_v14 }
  0x41   :  { %555 = vmatpush3.bf16.msra.mxu1 %v552_v33  ;;  %v71_v46 = vld [vmem:[%s819_s0] sm:$0xff]  ;;  %v192_v49 = vld [vmem:[#allocation4 + $0x30] sm:$0xff]  ;;  %v102_v52 = vld [vmem:[#allocation2 + $0xc8] sm:$0xff]  ;;  %v542_v54 = vpack.c.bf16 %v99_v48, %v97_v44 }
  0x42   :  { %531 = vmatpush1.bf16.msra.mxu0 %v530_v20  ;;  %557 = vmatprep.subr.bf16.mxu1 %v556_v37  ;;  %v796_v51 = vmul.f32 %v73_v40, %v71_v46  ;;  %v104_v53 = vld [vmem:[#allocation2 + $0xd8] sm:$0xff]  ;;  %v101_v55 = vld [vmem:[#allocation2 + $0xc0] sm:$0xff]  ;;  %v564_v56 = vpack.c.bf16 %v193_v50, %v192_v49  ;;  %v103_v58 = vld [vmem:[#allocation2 + $0xd0] sm:$0xff] }
  0x43   :  { %533 = vmatprep.subr.bf16.mxu0 %v532_v21  ;;  %v544_v57 = vpack.c.bf16 %v104_v53, %v102_v52  ;;  %v194_v59 = vld [vmem:[#allocation4 + $0x40] sm:$0xff]  ;;  %v195_v60 = vld [vmem:[#allocation4 + $0x48] sm:$0xff]  ;;  %v108_v62 = vld [vmem:[#allocation2 + $0xf8] sm:$0xff]  ;;  %v546_v63 = vpack.c.bf16 %v103_v58, %v101_v55 }
  0x44   :  { %482 = vmatprep.mubr.f32.mxu1 %v796_v51  ;;  %v106_v61 = vld [vmem:[#allocation2 + $0xe8] sm:$0xff]  ;;  %v105_v1 = vld [vmem:[#allocation2 + $0xe0] sm:$0xff]  ;;  %v568_v2 = vpack.c.bf16 %v195_v60, %v194_v59  ;;  %v107_v4 = vld [vmem:[#allocation2 + $0xf0] sm:$0xff] }
  0x45   :  { %559 = vmatpush3.bf16.msra.mxu1 %v556_v37  ;;  %v548_v3 = vpack.c.bf16 %v108_v62, %v106_v61  ;;  %v196_v5 = vld [vmem:[#allocation4 + $0x50] sm:$0xff]  ;;  %v197_v6 = vld [vmem:[#allocation4 + $0x58] sm:$0xff]  ;;  %v550_v7 = vpack.c.bf16 %v107_v4, %v105_v1  ;;  %v198_v9 = vld [vmem:[#allocation4 + $0x60] sm:$0xff] }
  0x46   :  { %535 = vmatpush1.bf16.msra.mxu0 %v534_v31  ;;  %561 = vmatprep.subr.bf16.mxu1 %v560_v45  ;;  %v572_v8 = vpack.c.bf16 %v197_v6, %v196_v5  ;;  %v199_v10 = vld [vmem:[#allocation4 + $0x68] sm:$0xff]  ;;  %v200_v12 = vld [vmem:[#allocation4 + $0x70] sm:$0xff]  ;;  %v201_v13 = vld [vmem:[#allocation4 + $0x78] sm:$0xff] }
  0x47   :  { %537 = vmatprep.subr.bf16.mxu0 %v536_v35  ;;  %v576_v11 = vpack.c.bf16 %v199_v10, %v198_v9  ;;  %v580_v15 = vpack.c.bf16 %v201_v13, %v200_v12  ;;  %v72_v17 = vld [vmem:[%s819_s0 + $0x8] sm:$0xff]  ;;  %v294_v19 = vld [vmem:[#allocation6] sm:$0xff]  ;;  %v296_v21 = vld [vmem:[#allocation6 + $0x10] sm:$0xff] }
  0x48   :  { %v76_v18 = vmul.f32 %v74_v16, %v72_v17  ;;  %v295_v20 = vld [vmem:[#allocation6 + $0x8] sm:$0xff]  ;;  %v297_v23 = vld [vmem:[#allocation6 + $0x18] sm:$0xff]  ;;  %v302_v30 = vld [vmem:[#allocation6 + $0x40] sm:$0xff] }
  0x49   :  { %563 = vmatpush3.bf16.msra.mxu1 %v560_v45  ;;  %v584_v22 = vpack.c.bf16 %v295_v20, %v294_v19  ;;  %v588_v24 = vpack.c.bf16 %v297_v23, %v296_v21  ;;  %v299_v25 = vld [vmem:[#allocation6 + $0x28] sm:$0xff]  ;;  %v301_v28 = vld [vmem:[#allocation6 + $0x38] sm:$0xff]  ;;  %v304_v33 = vld [vmem:[#allocation6 + $0x50] sm:$0xff] }
  0x4a   :  { %539 = vmatpush1.bf16.msra.mxu0 %v538_v43  ;;  %565 = vmatprep.subr.bf16.mxu1 %v564_v56  ;;  %v303_v31 = vld [vmem:[#allocation6 + $0x48] sm:$0xff]  ;;  %v305_v34 = vld [vmem:[#allocation6 + $0x58] sm:$0xff]  ;;  %v306_v44 = vld [vmem:[#allocation6 + $0x60] sm:$0xff] }
  0x4b   :  { %541 = vmatprep.subr.bf16.mxu0 %v540_v47  ;;  %v600_v32 = vpack.c.bf16 %v303_v31, %v302_v30  ;;  %v604_v35 = vpack.c.bf16 %v305_v34, %v304_v33  ;;  %v307_v45 = vld [vmem:[#allocation6 + $0x68] sm:$0xff]  ;;  %v308_v47 = vld [vmem:[#allocation6 + $0x70] sm:$0xff]  ;;  %v309_v48 = vld [vmem:[#allocation6 + $0x78] sm:$0xff] }
  0x4c   :  { %v608_v46 = vpack.c.bf16 %v307_v45, %v306_v44  ;;  %v612_v49 = vpack.c.bf16 %v309_v48, %v308_v47  ;;  %v408_v50 = vld [vmem:[%s823_s4] ss:$0 sm:$0xff] }
  0x4d   :  { %567 = vmatpush3.bf16.msra.mxu1 %v564_v56  ;;  %v409_v62 = vld [vmem:[%s825_s6] ss:$0 sm:$0xff] }
  0x4e   :  { %543 = vmatpush1.bf16.msra.mxu0 %v542_v54  ;;  %569 = vmatprep.subr.bf16.mxu1 %v568_v2 }
  0x4f   :  { %545 = vmatprep.subr.bf16.mxu0 %v544_v57 }
  0x51   :  { %571 = vmatpush3.bf16.msra.mxu1 %v568_v2 }
  0x52   :  { %547 = vmatpush1.bf16.msra.mxu0 %v546_v63  ;;  %573 = vmatprep.subr.bf16.mxu1 %v572_v8 }
  0x53   :  { %549 = vmatprep.subr.bf16.mxu0 %v548_v3 }
  0x55   :  { %575 = vmatpush3.bf16.msra.mxu1 %v572_v8 }
  0x56   :  { %551 = vmatpush1.bf16.msra.mxu0 %v550_v7  ;;  %577 = vmatprep.subr.bf16.mxu1 %v576_v11 }
  0x57   :  { %585 = vmatprep.subr.bf16.mxu0 %v584_v22 }
  0x59   :  { %174 = vmatmul.mubr.f32.vlgmr.msra.gmra.mrb[0].mxu0 %v412_v27  ;;  %579 = vmatpush3.bf16.msra.mxu1 %v576_v11  ;;  %v300_v27 = vld [vmem:[#allocation6 + $0x30] sm:$0xff] }
  0x5a   :  { %179 = vmatprep.mubr.f32.mxu0 %v701_v0  ;;  %581 = vmatprep.subr.bf16.mxu1 %v580_v15  ;;  %v298_v0 = vld [vmem:[#allocation6 + $0x20] sm:$0xff]  ;;  %v596_v29 = vpack.c.bf16 %v301_v28, %v300_v27 }
  0x5b   :  { %587 = vmatpush3.bf16.msra.mxu0 %v584_v22  ;;  %v592_v26 = vpack.c.bf16 %v299_v25, %v298_v0 }
  0x5c   :  { %589 = vmatprep.subr.bf16.mxu0 %v588_v24 }
  0x5d   :  { %180 = vmatmul.mubr.f32.gmra.mrb[2].mxu0 %v413_v14  ;;  %583 = vmatpush3.bf16.msra.mxu1 %v580_v15 }
  0x5f   :  { %591 = vmatpush3.bf16.msra.mxu0 %v588_v24 }
  0x60   :  { %483 = vmatmul.mubr.f32.vlgmr.msra.gmra.mrb[0].mxu1 %v76_v18  ;;  %593 = vmatprep.subr.bf16.mxu0 %v592_v26 }
  0x63   :  { %595 = vmatpush3.bf16.msra.mxu0 %v592_v26 }
  0x64   :  { %597 = vmatprep.subr.bf16.mxu0 %v596_v29 }
  0x67   :  { %599 = vmatpush3.bf16.msra.mxu0 %v596_v29 }
  0x68   :  { %601 = vmatprep.subr.bf16.mxu0 %v600_v32 }
  0x6b   :  { %603 = vmatpush3.bf16.msra.mxu0 %v600_v32 }
  0x6c   :  { %605 = vmatprep.subr.bf16.mxu0 %v604_v35 }
  0x6f   :  { %607 = vmatpush3.bf16.msra.mxu0 %v604_v35 }
  0x70   :  { %609 = vmatprep.subr.bf16.mxu0 %v608_v46 }
  0x73   :  { %611 = vmatpush3.bf16.msra.mxu0 %v608_v46 }
  0x74   :  { %613 = vmatprep.subr.bf16.mxu0 %v612_v49 }
  0x77   :  { %615 = vmatpush3.bf16.msra.mxu0 %v612_v49 }
 0x12c   :  { %v175_v36 = vpop.f32.mrb[0].mxu0 }
 0x12d   :  { %v177_v37 = vpop.f32.mrb[1].mxu0  ;;  %v203_v38 = vmul.f32 %v175_v36, %v796_v51 }
 0x12f   :  { %205 = vadd.xlane.f32.xlu0 %v203_v38 }
 0x130   :  { %v181_v39 = vpop.f32.mrb[2].mxu0 }
 0x131   :  { %v204_v40 = vmul.f32 %v181_v39, %v76_v18  ;;  %v183_v41 = vpop.f32.mrb[3].mxu0 }
 0x133   :  { %207 = vadd.xlane.f32.xlu0 %v204_v40  ;;  %v484_v42 = vpop.f32.mrb[0].mxu1 }
 0x134   :  { %v281_v43 = vpop.f32.mrb[1].mxu1  ;;  %v287_v54 = vadd.f32 %v484_v42, %v408_v50 }
 0x135   :  { %v282_v51 = vadd.f32 %v408_v50, %v281_v43 }
 0x1bc   :  { %v206_v52 = vpop.xlane.xlu0 %205 }
 0x1bd   :  { %v290_v53 = vadd.f32 %v282_v51, %v206_v52 }
 0x1bf   :  { %v292_v55 = vmax.f32 %v290_v53, 0.0 }
 0x1c0   :  { %v208_v56 = vpop.xlane.xlu0 %207 }
 0x1c1   :  { %v291_v57 = vadd.f32 %v287_v54, %v208_v56  ;;  %517 = vmatprep.mubr.f32.mxu0 %v292_v55  ;;  %v311_v58 = vmul.f32 %v292_v55, %v177_v37 }
 0x1c3   :  { %v293_v59 = vmax.f32 %v291_v57, 0.0  ;;  %313 = vadd.xlane.f32.xlu1 %v311_v58 }
 0x1c5   :  { %518 = vmatmul.mubr.f32.vlgmr.msra.gmra.mrb[4].mxu0 %v293_v59  ;;  %v312_v60 = vmul.f32 %v293_v59, %v183_v41 }
 0x1c7   :  { %315 = vadd.xlane.f32.xlu1 %v312_v60 }
 0x250   :  { %v314_v61 = vpop.xlane.xlu1 %313 }
 0x254   :  { %v316_v3 = vpop.xlane.xlu1 %315 }
 0x298   :  { %v519_v63 = vpop.f32.mrb[4].mxu0 }
 0x299   :  { %v395_v1 = vadd.f32 %v519_v63, %v409_v62  ;;  %v389_v2 = vpop.f32.mrb[5].mxu0 }
 0x29a   :  { %v390_v4 = vadd.f32 %v409_v62, %v389_v2 }
 0x29b   :  { %v399_v5 = vadd.f32 %v395_v1, %v316_v3 }
 0x29c   :  { %v398_v6 = vadd.f32 %v390_v4, %v314_v61 }
 0x29d   :  { %401 = vst [vmem:[%s826_s7 + $0x8] sm:$0xff] %v399_v5 }
 0x29e   :  { %400 = vst [vmem:[%s826_s7] sm:$0xff] %v398_v6 }
 0x29f   :  { %406 = vsyncpa [#allocation3], 1 }
 0x2a0   :  { %407 = vsyncpa [#allocation5], 1 }

</bundles_post_ra>
